<compile_context>
chip_gen: v6e
topology: v6e:2x2x1
jax: 0.10.0
libtpu: 0.0.40
codegen_flags: <defaults>
</compile_context>

<pallas_src>
import math

import jax
import jax.numpy as jnp
from jax import lax
from jax.experimental import pallas as pl
from jax.experimental.pallas import tpu as pltpu  # noqa: F401  (kept for TPU-specific tuning hooks)


def _attn_kernel(h_ref, e_ref, wh_ref, we_ref, b_ref, v_ref, o_ref):
    # h_ref : (B, Hid)       decoder hidden states
    # e_ref : (L, B*Hid)     module-native (L, B, Hid) buffer viewed 2-D
    #                        (row l = [enc[l,0,:] | enc[l,1,:] | ...]); no copy done.
    # wh_ref: (Hid, Hid)     weight[:, :Hid].T, prepared once at init ((in, out) layout)
    # we_ref: (Hid, Hid)     weight[:, Hid:].T, prepared once at init
    # b_ref : (1, Hid)       linear bias
    # v_ref : (1, Hid)       scoring vector
    # o_ref : (B, L)         softmaxed attention energies (wrapper adds the size-1 dim)
    B, Hid = h_ref.shape
    L = e_ref.shape[0]

    we = we_ref[...]                     # hoisted: loop-invariant operands
    vrow = v_ref[...]                    # (1, Hid)

    # Hidden projection + bias: one (B, Hid) @ (Hid, Hid) matmul for all rows.
    pre_h = jnp.dot(h_ref[...], wh_ref[...],
                    preferred_element_type=jnp.float32) + b_ref[...]      # (B, Hid)

    # B is tiny and static -> unrolled inside this single kernel invocation
    # (no extra grid steps, no per-step ~0.35us overhead).
    for b in range(B):
        # Batch-b encoder rows: static lane-slice of the wide view.  This pays
        # the (L,B,Hid)->batch-major relayout once in VMEM instead of as a
        # separate HBM->HBM transpose copy + extra XLA launch in the wrapper.
        e_b = e_ref[:, pl.ds(b * Hid, Hid)]                                # (L, Hid)

        # Encoder projection: plain (M,K)@(K,N) MXU matmul, full sublane fill
        # (L = 64 rows).  NOTE(scale-up): fuse with the hidden projection into a
        # single K=2*Hid matmul when Hid grows (marginal at Hid=32).
        pre_e = jnp.dot(e_b, we, preferred_element_type=jnp.float32)       # (L, Hid)
        energy = jnp.tanh(pre_e + pre_h[b:b + 1, :])                       # (L, Hid)

        # score[0, l] = <v, energy[l, :]> -- NT contraction keeps L on the lane
        # axis, so the softmax reductions and the store need no relayout.
        score = lax.dot_general(
            vrow, energy, dimension_numbers=(((1,), (1,)), ((), ())),
            preferred_element_type=jnp.float32)                            # (1, L)

        # Exact softmax (correctness fix: no approximate reciprocal).
        m = jnp.max(score, axis=-1, keepdims=True)
        p = jnp.exp(score - m)
        probs = p / jnp.sum(p, axis=-1, keepdims=True)

        o_ref[pl.ds(b, 1), :] = probs.astype(o_ref.dtype)


def prepare_attn_params(weight, bias, v):
    """One-time parameter preparation (init-time, NOT in the per-call path).

    weight: (Hid, 2*Hid) nn.Linear weight; bias: (Hid,); v: (Hid,).
    Returns (wh_t, we_t, bias2d, v2d) with both weight halves pre-transposed to
    (in, out) layout so the kernel issues plain (M,K)@(K,N) MXU matmuls.
    """
    Hid = weight.shape[0]
    wh_t = jnp.asarray(weight[:, :Hid].T)     # multiplies `hidden`   (cat's first half)
    we_t = jnp.asarray(weight[:, Hid:].T)     # multiplies `encoder`  (cat's second half)
    bias2d = bias.reshape(1, Hid)
    v2d = v.reshape(1, Hid)
    return wh_t, we_t, bias2d, v2d


@jax.jit
def attn_forward(hidden, encoder_outputs, wh_t, we_t, bias2d, v2d):
    """hidden: (B, Hid); encoder_outputs: (L, B, Hid) [module-native layout].
    Returns softmaxed attention energies of shape (B, 1, L)."""
    B, Hid = hidden.shape
    L = encoder_outputs.shape[0]
    assert encoder_outputs.shape == (L, B, Hid)

    # Contiguous view only (zero-copy under jit) -- the old transpose+reshape
    # HBM copy is gone; the batch de-interleave happens in-kernel in VMEM.
    enc_wide = encoder_outputs.reshape(L, B * Hid)

    out2d = pl.pallas_call(
        _attn_kernel,
        out_shape=jax.ShapeDtypeStruct((B, L), jnp.float32),
        grid=(1,),  # single grid step: whole batch, no pipelining to tune
        in_specs=[
            pl.BlockSpec((B, Hid), lambda i: (0, 0)),
            pl.BlockSpec((L, B * Hid), lambda i: (0, 0)),
            pl.BlockSpec((Hid, Hid), lambda i: (0, 0)),
            pl.BlockSpec((Hid, Hid), lambda i: (0, 0)),
            pl.BlockSpec((1, Hid), lambda i: (0, 0)),
            pl.BlockSpec((1, Hid), lambda i: (0, 0)),
        ],
        out_specs=pl.BlockSpec((B, L), lambda i: (0, 0)),
    )(hidden, enc_wide, wh_t, we_t, bias2d, v2d)

    # Free (contiguous) reshape to the module's (B, 1, L) output convention.
    return out2d[:, None, :]


def attn_reference(hidden, encoder_outputs, weight, bias, v):
    """Pure-JAX reference mirroring the PyTorch forward exactly."""
    L = encoder_outputs.shape[0]
    H = jnp.broadcast_to(hidden[None], (L,) + hidden.shape).transpose(1, 0, 2)  # (B, L, Hid)
    enc = encoder_outputs.transpose(1, 0, 2)                                    # (B, L, Hid)
    cat = jnp.concatenate([H, enc], axis=2)                                     # (B, L, 2*Hid)
    energy = jnp.tanh(cat @ weight.T + bias)                                    # (B, L, Hid)
    score = jnp.einsum("blh,h->bl", energy, v)                                  # (B, L)
    return jax.nn.softmax(score, axis=1)[:, None, :]                            # (B, 1, L)


if __name__ == "__main__":
    B = 2
    hidden_size = 32
    embed_size = 32      # unused in forward (as in the PyTorch module)
    onehot_size = 16     # unused in forward
    Hsp, Wsp = 8, 8
    L = Hsp * Wsp

    key = jax.random.PRNGKey(0)
    k1, k2, k3, k4, k5 = jax.random.split(key, 5)

    # Deterministic parameter init matching the module's shapes:
    #   attn = nn.Linear(2*hidden, hidden)  -> weight (hidden, 2*hidden), bias (hidden,)
    #   v ~ Normal(0, 1/sqrt(hidden))       -> (hidden,)
    bound = 1.0 / math.sqrt(2 * hidden_size)
    weight = jax.random.uniform(k1, (hidden_size, 2 * hidden_size),
                                jnp.float32, -bound, bound)
    bias = jax.random.uniform(k2, (hidden_size,), jnp.float32, -bound, bound)
    stdv = 1.0 / math.sqrt(hidden_size)
    v = jax.random.normal(k3, (hidden_size,), jnp.float32) * stdv

    hidden = jax.random.normal(k4, (B, hidden_size), jnp.float32)
    encoder_outputs = jax.random.normal(k5, (L, B, hidden_size), jnp.float32)

    # One-time parameter prep (outside the per-call hot path).
    wh_t, we_t, bias2d, v2d = prepare_attn_params(weight, bias, v)

    out = attn_forward(hidden, encoder_outputs, wh_t, we_t, bias2d, v2d)
    out = jax.block_until_ready(out)

    ref = attn_reference(hidden, encoder_outputs, weight, bias, v)
    assert out.shape == (B, 1, L), out.shape
    # Exact f32 everywhere (exact softmax divide); tolerance only absorbs
    # accumulation-order / transcendental-implementation differences.
    assert jnp.allclose(out, ref, rtol=1e-3, atol=1e-5), (
        "mismatch vs reference: max abs err "
        f"{float(jnp.max(jnp.abs(out - ref)))}")

    print("KERNEL_OK")
</pallas_src>

<mosaic_0001>
module attributes {stable_mosaic.version = 11 : i64} {
  func.func @_attn_kernel(%arg0: i32, %arg1: memref<2x32xf32, #tpu.memory_space<vmem>>, %arg2: memref<64x64xf32, #tpu.memory_space<vmem>>, %arg3: memref<32x32xf32, #tpu.memory_space<vmem>>, %arg4: memref<32x32xf32, #tpu.memory_space<vmem>>, %arg5: memref<1x32xf32, #tpu.memory_space<vmem>>, %arg6: memref<1x32xf32, #tpu.memory_space<vmem>>, %arg7: memref<2x64xf32, #tpu.memory_space<vmem>>) attributes {dimension_semantics = [#tpu.dimension_semantics<arbitrary>], iteration_bounds = array<i64: 1>, scalar_prefetch = 0 : i64, scratch_operands = 0 : i64, tpu.core_type = #tpu.core_type<tc>, window_params = [{pipeline_mode = #tpu.pipeline_mode<synchronous>, transform_indices = @transform_0, window_bounds = array<i64: 2, 32>}, {pipeline_mode = #tpu.pipeline_mode<synchronous>, transform_indices = @transform_1, window_bounds = array<i64: 64, 64>}, {pipeline_mode = #tpu.pipeline_mode<synchronous>, transform_indices = @transform_2, window_bounds = array<i64: 32, 32>}, {pipeline_mode = #tpu.pipeline_mode<synchronous>, transform_indices = @transform_3, window_bounds = array<i64: 32, 32>}, {pipeline_mode = #tpu.pipeline_mode<synchronous>, transform_indices = @transform_4, window_bounds = array<i64: 1, 32>}, {pipeline_mode = #tpu.pipeline_mode<synchronous>, transform_indices = @transform_5, window_bounds = array<i64: 1, 32>}, {pipeline_mode = #tpu.pipeline_mode<synchronous>, transform_indices = @transform_6, window_bounds = array<i64: 2, 64>}]} {
    %c0 = arith.constant 0 : index
    %c0_0 = arith.constant 0 : index
    %0 = vector.load %arg4[%c0, %c0_0] : memref<32x32xf32, #tpu.memory_space<vmem>>, vector<32x32xf32>
    %c0_1 = arith.constant 0 : index
    %c0_2 = arith.constant 0 : index
    %1 = vector.load %arg6[%c0_1, %c0_2] : memref<1x32xf32, #tpu.memory_space<vmem>>, vector<1x32xf32>
    %c0_3 = arith.constant 0 : index
    %c0_4 = arith.constant 0 : index
    %2 = vector.load %arg1[%c0_3, %c0_4] : memref<2x32xf32, #tpu.memory_space<vmem>>, vector<2x32xf32>
    %c0_5 = arith.constant 0 : index
    %c0_6 = arith.constant 0 : index
    %3 = vector.load %arg3[%c0_5, %c0_6] : memref<32x32xf32, #tpu.memory_space<vmem>>, vector<32x32xf32>
    %cst = arith.constant dense<0.000000e+00> : vector<2x32xf32>
    %4 = tpu.matmul %2, %3, %cst {dimension_numbers = #tpu.dot_dimension_numbers<[1], [0], [0], [1], [0, 0, 1, 1], [], []>} : vector<2x32xf32>, vector<32x32xf32>, vector<2x32xf32> -> vector<2x32xf32>
    %c0_7 = arith.constant 0 : index
    %c0_8 = arith.constant 0 : index
    %5 = vector.load %arg5[%c0_7, %c0_8] : memref<1x32xf32, #tpu.memory_space<vmem>>, vector<1x32xf32>
    %6 = vector.broadcast %5 : vector<1x32xf32> to vector<2x32xf32>
    %7 = arith.addf %4, %6 : vector<2x32xf32>
    %c0_9 = arith.constant 0 : index
    %c0_10 = arith.constant 0 : index
    %8 = vector.load %arg2[%c0_9, %c0_10] : memref<64x64xf32, #tpu.memory_space<vmem>>, vector<64x32xf32>
    %cst_11 = arith.constant dense<0.000000e+00> : vector<64x32xf32>
    %9 = tpu.matmul %8, %0, %cst_11 {dimension_numbers = #tpu.dot_dimension_numbers<[1], [0], [0], [1], [0, 0, 1, 1], [], []>} : vector<64x32xf32>, vector<32x32xf32>, vector<64x32xf32> -> vector<64x32xf32>
    %10 = vector.extract_strided_slice %7 {offsets = [0, 0], sizes = [1, 32], strides = [1, 1]} : vector<2x32xf32> to vector<1x32xf32>
    %11 = vector.broadcast %10 : vector<1x32xf32> to vector<64x32xf32>
    %12 = arith.addf %9, %11 : vector<64x32xf32>
    %13 = math.tanh %12 : vector<64x32xf32>
    %cst_12 = arith.constant dense<0.000000e+00> : vector<1x64xf32>
    %14 = tpu.matmul %1, %13, %cst_12 {dimension_numbers = #tpu.dot_dimension_numbers<[1], [1], [0], [0], [0, 0, 1, 0], [], []>} : vector<1x32xf32>, vector<64x32xf32>, vector<1x64xf32> -> vector<1x64xf32>
    %cst_13 = arith.constant dense<0xFF800000> : vector<1xf32>
    %15 = vector.multi_reduction <maximumf>, %14, %cst_13 [1] : vector<1x64xf32> to vector<1xf32>
    %16 = vector.shape_cast %15 : vector<1xf32> to vector<1x1xf32>
    %17 = vector.broadcast %16 : vector<1x1xf32> to vector<1x64xf32>
    %18 = arith.subf %14, %17 : vector<1x64xf32>
    %19 = math.exp %18 : vector<1x64xf32>
    %cst_14 = arith.constant dense<0.000000e+00> : vector<1xf32>
    %20 = vector.multi_reduction <add>, %19, %cst_14 [1] : vector<1x64xf32> to vector<1xf32>
    %21 = vector.shape_cast %20 : vector<1xf32> to vector<1x1xf32>
    %22 = vector.broadcast %21 : vector<1x1xf32> to vector<1x64xf32>
    %23 = arith.divf %19, %22 : vector<1x64xf32>
    %c0_15 = arith.constant 0 : index
    %c0_16 = arith.constant 0 : index
    %24 = vector.load %arg7[%c0_15, %c0_16] : memref<2x64xf32, #tpu.memory_space<vmem>>, vector<1x64xf32>
    tpu.vector_store %arg7[%c0_15, %c0_16], %23 {strides = array<i32>} : memref<2x64xf32, #tpu.memory_space<vmem>>, vector<1x64xf32>,
    %c0_17 = arith.constant 0 : index
    %c32 = arith.constant 32 : index
    %25 = vector.load %arg2[%c0_17, %c32] : memref<64x64xf32, #tpu.memory_space<vmem>>, vector<64x32xf32>
    %cst_18 = arith.constant dense<0.000000e+00> : vector<64x32xf32>
    %26 = tpu.matmul %25, %0, %cst_18 {dimension_numbers = #tpu.dot_dimension_numbers<[1], [0], [0], [1], [0, 0, 1, 1], [], []>} : vector<64x32xf32>, vector<32x32xf32>, vector<64x32xf32> -> vector<64x32xf32>
    %27 = vector.extract_strided_slice %7 {offsets = [1, 0], sizes = [1, 32], strides = [1, 1]} : vector<2x32xf32> to vector<1x32xf32>
    %28 = vector.broadcast %27 : vector<1x32xf32> to vector<64x32xf32>
    %29 = arith.addf %26, %28 : vector<64x32xf32>
    %30 = math.tanh %29 : vector<64x32xf32>
    %cst_19 = arith.constant dense<0.000000e+00> : vector<1x64xf32>
    %31 = tpu.matmul %1, %30, %cst_19 {dimension_numbers = #tpu.dot_dimension_numbers<[1], [1], [0], [0], [0, 0, 1, 0], [], []>} : vector<1x32xf32>, vector<64x32xf32>, vector<1x64xf32> -> vector<1x64xf32>
    %cst_20 = arith.constant dense<0xFF800000> : vector<1xf32>
    %32 = vector.multi_reduction <maximumf>, %31, %cst_20 [1] : vector<1x64xf32> to vector<1xf32>
    %33 = vector.shape_cast %32 : vector<1xf32> to vector<1x1xf32>
    %34 = vector.broadcast %33 : vector<1x1xf32> to vector<1x64xf32>
    %35 = arith.subf %31, %34 : vector<1x64xf32>
    %36 = math.exp %35 : vector<1x64xf32>
    %cst_21 = arith.constant dense<0.000000e+00> : vector<1xf32>
    %37 = vector.multi_reduction <add>, %36, %cst_21 [1] : vector<1x64xf32> to vector<1xf32>
    %38 = vector.shape_cast %37 : vector<1xf32> to vector<1x1xf32>
    %39 = vector.broadcast %38 : vector<1x1xf32> to vector<1x64xf32>
    %40 = arith.divf %36, %39 : vector<1x64xf32>
    %c1 = arith.constant 1 : index
    %c0_22 = arith.constant 0 : index
    %41 = vector.load %arg7[%c1, %c0_22] : memref<2x64xf32, #tpu.memory_space<vmem>>, vector<1x64xf32>
    tpu.vector_store %arg7[%c1, %c0_22], %40 {strides = array<i32>} : memref<2x64xf32, #tpu.memory_space<vmem>>, vector<1x64xf32>,
    return
  }
  func.func @transform_0(%arg0: i32) -> (i32, i32) {
    %c0_i32 = arith.constant 0 : i32
    %c0_i32_0 = arith.constant 0 : i32
    %c0_i32_1 = arith.constant 0 : i32
    return %c0_i32, %c0_i32_0 : i32, i32
  }
  func.func @transform_1(%arg0: i32) -> (i32, i32) {
    %c0_i32 = arith.constant 0 : i32
    %c0_i32_0 = arith.constant 0 : i32
    %c0_i32_1 = arith.constant 0 : i32
    return %c0_i32, %c0_i32_0 : i32, i32
  }
  func.func @transform_2(%arg0: i32) -> (i32, i32) {
    %c0_i32 = arith.constant 0 : i32
    %c0_i32_0 = arith.constant 0 : i32
    %c0_i32_1 = arith.constant 0 : i32
    return %c0_i32, %c0_i32_0 : i32, i32
  }
  func.func @transform_3(%arg0: i32) -> (i32, i32) {
    %c0_i32 = arith.constant 0 : i32
    %c0_i32_0 = arith.constant 0 : i32
    %c0_i32_1 = arith.constant 0 : i32
    return %c0_i32, %c0_i32_0 : i32, i32
  }
  func.func @transform_4(%arg0: i32) -> (i32, i32) {
    %c0_i32 = arith.constant 0 : i32
    %c0_i32_0 = arith.constant 0 : i32
    %c0_i32_1 = arith.constant 0 : i32
    return %c0_i32, %c0_i32_0 : i32, i32
  }
  func.func @transform_5(%arg0: i32) -> (i32, i32) {
    %c0_i32 = arith.constant 0 : i32
    %c0_i32_0 = arith.constant 0 : i32
    %c0_i32_1 = arith.constant 0 : i32
    return %c0_i32, %c0_i32_0 : i32, i32
  }
  func.func @transform_6(%arg0: i32) -> (i32, i32) {
    %c0_i32 = arith.constant 0 : i32
    %c0_i32_0 = arith.constant 0 : i32
    %c0_i32_1 = arith.constant 0 : i32
    return %c0_i32, %c0_i32_0 : i32, i32
  }
}

</mosaic_0001>

<bundles_post_ra>
// kernel: attn_forward.1
= control target key start
LH: loop header
LB: loop body
LE: loop exit
PB: predicated region body
PF: predicated region fallthrough
CT: control target
= control target key end

     0   :  { %s897_s25 = smov 96   ;;  %v898_v2 = vmov 0.0   ;;  %vm899_vm0 = vmmov 0   ;;  %vm41_vm1 = vcmask 261120   ;;  %s1081_s0 = inlined_call_operand.vmem [shape: f32[2,32], index: 0, kind: input, shape index: {}]   ;;  %s1082_s1 = inlined_call_operand.vmem [shape: f32[64,64], index: 1, kind: input, shape index: {}]   ;;  %s1083_s2 = inlined_call_operand.vmem [shape: f32[32,32], index: 2, kind: input, shape index: {}]   ;;  %s1084_s3 = inlined_call_operand.vmem [shape: f32[32,32], index: 3, kind: input, shape index: {}]   ;;  %s1085_s4 = inlined_call_operand.vmem [shape: f32[1,32], index: 4, kind: input, shape index: {}]   ;;  %s1086_s5 = inlined_call_operand.vmem [shape: f32[1,32], index: 5, kind: input, shape index: {}]   ;;  %s1087_s6 = inlined_call_operand.hbm [shape: f32[2,64], index: 6, kind: output, shape index: {}]  }
   0x1   :  { %v374_v0 = vld [vmem:[%s1082_s1] sm:$0xff]  ;;  %v33_v1 = vld [vmem:[%s1083_s2 + $0x18] sm:$0xff]  ;;  %742 = vmatprep.subr.mxu0 %v898_v2  ;;  %v32_v3 = vld [vmem:[%s1083_s2 + $0x10] sm:$0xff]  ;;  %750 = vmatprep.mubr.msk.f32.mxu0 %vm899_vm0, %v898_v2 }
   0x2   :  { %394 = vrot.lane.b32.xlu0 %v374_v0, %s897_s25  ;;  %v376_v4 = vld [vmem:[%s1082_s1 + $0x10] sm:$0xff]  ;;  %743 = vmatpush3.msra.mxu0 %v33_v1  ;;  %v375_v5 = vld [vmem:[%s1082_s1 + $0x8] sm:$0xff]  ;;  %v377_v7 = vld [vmem:[%s1082_s1 + $0x18] sm:$0xff] }
   0x3   :  { %398 = vrot.lane.b32.xlu1 %v376_v4, %s897_s25  ;;  %744 = vmatprep.subr.mxu0 %v898_v2  ;;  %v31_v6 = vld [vmem:[%s1083_s2 + $0x8] sm:$0xff]  ;;  %v27_v8 = vld [vmem:[%s1084_s3 + $0x18] sm:$0xff]  ;;  %v30_v9 = vld [vmem:[%s1083_s2] sm:$0xff] }
   0x4   :  { %745 = vmatpush3.msra.mxu0 %v32_v3  ;;  %792 = vmatprep.subr.mxu1 %v27_v8  ;;  %v29_v10 = vld [vmem:[%s1081_s0] sm:$0x3] }
   0x5   :  { %746 = vmatprep.subr.mxu0 %v898_v2 }
   0x6   :  { %396 = vrot.lane.b32.xlu0 %v375_v5, %s897_s25  ;;  %747 = vmatpush3.msra.mxu0 %v31_v6 }
   0x7   :  { %400 = vrot.lane.b32.xlu1 %v377_v7, %s897_s25 }
   0x8   :  { %11 = vsyncpa [#allocation3], 0  ;;  %748 = vmatprep.subr.mxu0 %v898_v2  ;;  %v26_v11 = vld [vmem:[%s1084_s3 + $0x10] sm:$0xff]  ;;  %v378_v12 = vld [vmem:[%s1082_s1 + $0x20] sm:$0xff]  ;;  %793 = vmatpush3.msra.mxu1 %v27_v8  ;;  %v123_v26 = vlaneseq  ;;  %vm361_vm2 = vcmask 516096  }
   0x9   :  { %749 = vmatpush3.msra.mxu0 %v30_v9  ;;  %v379_v13 = vld [vmem:[%s1082_s1 + $0x28] sm:$0xff]  ;;  %794 = vmatprep.subr.mxu1 %v26_v11  ;;  %v380_v15 = vld [vmem:[%s1082_s1 + $0x30] sm:$0xff]  ;;  %v24_v16 = vld [vmem:[%s1084_s3] sm:$0xff] }
   0xa   :  { %753 = vmatprep.subr.mxu0 %v27_v8  ;;  %751 = vmatmul.mubr.msk.f32.vlgmr.msra.gmra.mxu0 %vm41_vm1, %v29_v10  ;;  %v25_v14 = vld [vmem:[%s1084_s3 + $0x8] sm:$0xff]  ;;  %v381_v17 = vld [vmem:[%s1082_s1 + $0x38] sm:$0xff]  ;;  %v124_v27 = vshrl.u32 %v123_v26, 7  ;;  %v659_v28 = vld [vmem:[%s1085_s4] ss:$0 sm:$0xff] }
   0xb   :  { %754 = vmatpush3.msra.mxu0 %v27_v8  ;;  %402 = vrot.lane.b32.xlu0 %v378_v12, %s897_s25  ;;  %v28_v60 = vld [vmem:[%s1086_s5] sm:$0x1]  ;;  %s900_s5 = smov [#allocation2]  }
   0xc   :  { %755 = vmatprep.subr.mxu0 %v26_v11  ;;  %404 = vrot.lane.b32.xlu1 %v379_v13, %s897_s25  ;;  %v384_v29 = vsub.s32 1, %v124_v27  ;;  %v125_v37 = vsub.s32 0, %v124_v27  ;;  %s651_s7 = sshll.u32 %s900_s5, 4  ;;  %s652_s7 = int_to_ptr.vmem [resolvable:$true] %s651_s7 }
   0xd   :  { %756 = vmatpush3.msra.mxu0 %v26_v11  ;;  %761 = vmatprep.mubr.msk.f32.mxu0 %vm41_vm1, %v374_v0  ;;  %s875_s8 = scalar_lea.vmem %s652_s7, 32  ;;  %p880_p1 = scmp.lt.s32.totalorder %s652_s7, %s652_s7 }
   0xe   :  { %757 = vmatprep.subr.mxu0 %v25_v14  ;;  %795 = vmatpush3.msra.mxu1 %v26_v11  ;;  %p876_p0 = scmp.ne.s32.totalorder %s652_s7, %s875_s8  ;;  %p881_p2 = scmp.lt.s32.totalorder %s875_s8, %s875_s8 }
   0xf   :  { %758 = vmatpush3.msra.mxu0 %v25_v14  ;;  %406 = vrot.lane.b32.xlu0 %v380_v15, %s897_s25 }
  0x10   :  { %759 = vmatprep.subr.mxu0 %v24_v16  ;;  %408 = vrot.lane.b32.xlu1 %v381_v17, %s897_s25  ;;  %p882_p3 = por %p881_p2, %p880_p1 }
  0x11   :  { %760 = vmatpush3.msra.mxu0 %v24_v16  ;;  %796 = vmatprep.subr.mxu1 %v25_v14 }
  0x12   :  { %762 = vmatmul.mubr.msk.f32.vlgmr.msra.gmra.mxu0 %vm41_vm1, %v375_v5  ;;  %797 = vmatpush3.msra.mxu1 %v25_v14  ;;  %p883_p4 = pnand %p882_p3, %p876_p0 }
  0x13   :  { %764 = vmatprep.mubr.msk.f32.mxu0 %vm41_vm1, %v376_v4  ;;  %798 = vmatprep.subr.mxu1 %v24_v16 }
  0x14   :  { %799 = vmatpush3.msra.mxu1 %v24_v16  ;;  %773 = vmatprep.subr.mxu0 %v898_v2 }
  0x15   :  { %812 = vmatprep.subr.mxu1 %v898_v2 }
  0x16   :  { %765 = vmatmul.mubr.msk.f32.gmra.mxu0 %vm41_vm1, %v377_v7 }
  0x17   :  { %767 = vmatprep.mubr.msk.f32.mxu0 %vm41_vm1, %v378_v12 }
  0x1a   :  { %768 = vmatmul.mubr.msk.f32.gmra.mxu0 %vm41_vm1, %v379_v13 }
  0x1b   :  { %770 = vmatprep.mubr.msk.f32.mxu0 %vm41_vm1, %v380_v15 }
  0x1e   :  { %771 = vmatmul.mubr.msk.f32.gmra.mxu0 %vm41_vm1, %v381_v17 }
  0x1f   :  { %789 = vmatprep.mubr.msk.f32.mxu0 %vm899_vm0, %v898_v2 }
  0x74   :  { %v395_v18 = vpop.permute.xlu0 %394 }
  0x75   :  { %800 = vmatprep.mubr.msk.f32.mxu1 %vm41_vm1, %v395_v18  ;;  %v399_v19 = vpop.permute.xlu1 %398 }
  0x78   :  { %v397_v20 = vpop.permute.xlu0 %396 }
  0x79   :  { %801 = vmatmul.mubr.msk.f32.vlgmr.msra.gmra.mxu1 %vm41_vm1, %v397_v20  ;;  %v401_v21 = vpop.permute.xlu1 %400 }
  0x7a   :  { %803 = vmatprep.mubr.msk.f32.mxu1 %vm41_vm1, %v399_v19 }
  0x7d   :  { %804 = vmatmul.mubr.msk.f32.gmra.mxu1 %vm41_vm1, %v401_v21  ;;  %v403_v22 = vpop.permute.xlu0 %402 }
  0x7e   :  { %v405_v23 = vpop.permute.xlu1 %404  ;;  %806 = vmatprep.mubr.msk.f32.mxu1 %vm41_vm1, %v403_v22 }
  0x81   :  { %807 = vmatmul.mubr.msk.f32.gmra.mxu1 %vm41_vm1, %v405_v23  ;;  %v407_v24 = vpop.permute.xlu0 %406 }
  0x82   :  { %v409_v25 = vpop.permute.xlu1 %408  ;;  %809 = vmatprep.mubr.msk.f32.mxu1 %vm41_vm1, %v407_v24 }
  0x85   :  { %810 = vmatmul.mubr.msk.f32.gmra.mxu1 %vm41_vm1, %v409_v25 }
  0x86   :  { %828 = vmatprep.mubr.msk.f32.mxu1 %vm899_vm0, %v898_v2 }
  0xca   :  { %v111_v30 = vpop.f32.mrf.mxu0 }
  0xcb   :  { %v112_v31 = vadd.f32 %v659_v28, %v111_v30 }
  0xcc   :  { %v752_v32 = vpop.f32.mrf.mxu0 }
  0xcd   :  { %v1027_v33 = vrot.slane %v112_v31, %v384_v29  ;;  %v126_v40 = vrot.slane %v112_v31, %v125_v37 }
  0xd2   :  { %v763_v34 = vpop.f32.mrf.mxu0 }
  0xd3   :  { %v223_v52 = vadd.f32 %v763_v34, %v126_v40 }
  0xd4   :  { %v217_v35 = vpop.f32.mrf.mxu0 }
  0xd5   :  { %v218_v54 = vadd.f32 %v217_v35, %v126_v40 }
  0xd6   :  { %v766_v36 = vpop.f32.mrf.mxu0 }
  0xd7   :  { %v233_v48 = vadd.f32 %v766_v36, %v126_v40 }
  0xd8   :  { %v227_v38 = vpop.f32.mrf.mxu0 }
  0xd9   :  { %v228_v50 = vadd.f32 %v227_v38, %v126_v40 }
  0xda   :  { %v769_v39 = vpop.f32.mrf.mxu0 }
  0xdb   :  { %v243_v46 = vadd.f32 %v769_v39, %v126_v40 }
  0xdc   :  { %v237_v41 = vpop.f32.mrf.mxu0 }
  0xdd   :  { %v238_v47 = vadd.f32 %v237_v41, %v126_v40 }
  0xde   :  { %v772_v42 = vpop.f32.mrf.mxu0 }
  0xdf   :  { %v253_v43 = vadd.f32 %v772_v42, %v126_v40 }
  0xe0   :  { %v247_v44 = vpop.f32.mrf.mxu0 }
  0xe1   :  { %835 = vtanh.f32 %v253_v43  ;;  %v248_v45 = vadd.f32 %v247_v44, %v126_v40 }
  0xe3   :  { %837 = vtanh.f32 %v248_v45 }
  0xe4   :  { %839 = vtanh.f32 %v243_v46 }
  0xe5   :  { %841 = vtanh.f32 %v238_v47 }
  0xe6   :  { %843 = vtanh.f32 %v233_v48 }
  0xe7   :  { %845 = vtanh.f32 %v228_v50 }
  0xe8   :  { %847 = vtanh.f32 %v223_v52 }
  0xe9   :  { %849 = vtanh.f32 %v218_v54 }
  0xee   :  { %v836_v49 = vpop.eup %835 }
  0xef   :  { %774 = vmatpush3.xpose.msk.msra.mxu0 %vm41_vm1, %v836_v49 }
  0xf0   :  { %v838_v51 = vpop.eup %837  ;;  %775 = vmatprep.subr.mxu0 %v898_v2 }
  0xf1   :  { %v840_v53 = vpop.eup %839 }
  0xf2   :  { %v842_v55 = vpop.eup %841 }
  0xf3   :  { %776 = vmatpush3.xpose.msk.msra.mxu0 %vm41_vm1, %v838_v51  ;;  %v844_v56 = vpop.eup %843 }
  0xf4   :  { %777 = vmatprep.subr.mxu0 %v898_v2  ;;  %v846_v57 = vpop.eup %845 }
  0xf5   :  { %v848_v58 = vpop.eup %847 }
  0xf6   :  { %v850_v59 = vpop.eup %849 }
  0xf7   :  { %778 = vmatpush3.xpose.msk.msra.mxu0 %vm41_vm1, %v840_v53 }
  0xf8   :  { %779 = vmatprep.subr.mxu0 %v898_v2 }
  0xfb   :  { %780 = vmatpush3.xpose.msk.msra.mxu0 %vm41_vm1, %v842_v55 }
  0xfc   :  { %781 = vmatprep.subr.mxu0 %v898_v2 }
  0xff   :  { %782 = vmatpush3.xpose.msk.msra.mxu0 %vm41_vm1, %v844_v56 }
 0x100   :  { %783 = vmatprep.subr.mxu0 %v898_v2 }
 0x103   :  { %784 = vmatpush3.xpose.msk.msra.mxu0 %vm41_vm1, %v846_v57 }
 0x104   :  { %785 = vmatprep.subr.mxu0 %v898_v2 }
 0x107   :  { %786 = vmatpush3.xpose.msk.msra.mxu0 %vm41_vm1, %v848_v58 }
 0x108   :  { %787 = vmatprep.subr.mxu0 %v898_v2 }
 0x10b   :  { %788 = vmatpush3.xpose.msk.msra.mxu0 %vm41_vm1, %v850_v59 }
 0x10e   :  { %790 = vmatmul.mubr.msk.f32.vlgmr.msra.gmra.mxu0 %vm41_vm1, %v28_v60 }
 0x139   :  { %v802_v61 = vpop.f32.mrf.mxu1 }
 0x13a   :  { %v498_v14 = vadd.f32 %v802_v61, %v1027_v33 }
 0x13b   :  { %v492_v62 = vpop.f32.mrf.mxu1 }
 0x13c   :  { %v493_v16 = vadd.f32 %v492_v62, %v1027_v33 }
 0x13d   :  { %v805_v63 = vpop.f32.mrf.mxu1 }
 0x13e   :  { %v508_v10 = vadd.f32 %v805_v63, %v1027_v33 }
 0x13f   :  { %v502_v0 = vpop.f32.mrf.mxu1 }
 0x140   :  { %v503_v12 = vadd.f32 %v502_v0, %v1027_v33 }
 0x141   :  { %v808_v1 = vpop.f32.mrf.mxu1 }
 0x142   :  { %v518_v8 = vadd.f32 %v808_v1, %v1027_v33 }
 0x143   :  { %v512_v3 = vpop.f32.mrf.mxu1 }
 0x144   :  { %v513_v9 = vadd.f32 %v512_v3, %v1027_v33 }
 0x145   :  { %v811_v4 = vpop.f32.mrf.mxu1 }
 0x146   :  { %v528_v5 = vadd.f32 %v811_v4, %v1027_v33 }
 0x147   :  { %v522_v6 = vpop.f32.mrf.mxu1 }
 0x148   :  { %851 = vtanh.f32 %v528_v5  ;;  %v523_v7 = vadd.f32 %v522_v6, %v1027_v33 }
 0x14a   :  { %853 = vtanh.f32 %v523_v7 }
 0x14b   :  { %855 = vtanh.f32 %v518_v8 }
 0x14c   :  { %857 = vtanh.f32 %v513_v9 }
 0x14d   :  { %859 = vtanh.f32 %v508_v10 }
 0x14e   :  { %861 = vtanh.f32 %v503_v12 }
 0x14f   :  { %863 = vtanh.f32 %v498_v14 }
 0x150   :  { %865 = vtanh.f32 %v493_v16 }
 0x155   :  { %v852_v11 = vpop.eup %851 }
 0x156   :  { %813 = vmatpush3.xpose.msk.msra.mxu1 %vm41_vm1, %v852_v11 }
 0x157   :  { %814 = vmatprep.subr.mxu1 %v898_v2  ;;  %v854_v13 = vpop.eup %853 }
 0x158   :  { %v856_v15 = vpop.eup %855 }
 0x159   :  { %v858_v17 = vpop.eup %857 }
 0x15a   :  { %815 = vmatpush3.xpose.msk.msra.mxu1 %vm41_vm1, %v854_v13  ;;  %v860_v18 = vpop.eup %859 }
 0x15b   :  { %816 = vmatprep.subr.mxu1 %v898_v2  ;;  %v862_v19 = vpop.eup %861 }
 0x15c   :  { %v864_v20 = vpop.eup %863 }
 0x15d   :  { %v866_v21 = vpop.eup %865 }
 0x15e   :  { %817 = vmatpush3.xpose.msk.msra.mxu1 %vm41_vm1, %v856_v15 }
 0x15f   :  { %818 = vmatprep.subr.mxu1 %v898_v2 }
 0x162   :  { %819 = vmatpush3.xpose.msk.msra.mxu1 %vm41_vm1, %v858_v17 }
 0x163   :  { %820 = vmatprep.subr.mxu1 %v898_v2 }
 0x166   :  { %821 = vmatpush3.xpose.msk.msra.mxu1 %vm41_vm1, %v860_v18 }
 0x167   :  { %822 = vmatprep.subr.mxu1 %v898_v2 }
 0x16a   :  { %823 = vmatpush3.xpose.msk.msra.mxu1 %vm41_vm1, %v862_v19 }
 0x16b   :  { %824 = vmatprep.subr.mxu1 %v898_v2 }
 0x16e   :  { %825 = vmatpush3.xpose.msk.msra.mxu1 %vm41_vm1, %v864_v20 }
 0x16f   :  { %826 = vmatprep.subr.mxu1 %v898_v2 }
 0x172   :  { %827 = vmatpush3.xpose.msk.msra.mxu1 %vm41_vm1, %v866_v21 }
 0x175   :  { %829 = vmatmul.mubr.msk.f32.vlgmr.msra.gmra.mxu1 %vm41_vm1, %v28_v60 }
 0x1ce   :  { %v357_v22 = vpop.f32.mrf.mxu0 }
 0x1cf   :  { %v362_v23 = vsel %vm361_vm2, %v357_v22, -inf }
 0x1d0   :  { %363 = vmax.xlane.f32.xlu0 %v362_v23  ;;  %v791_v24 = vpop.f32.mrf.mxu0 }
 0x235   :  { %v629_v25 = vpop.f32.mrf.mxu1 }
 0x236   :  { %v633_v26 = vsel %vm361_vm2, %v629_v25, -inf }
 0x237   :  { %634 = vmax.xlane.f32.xlu1 %v633_v26  ;;  %v830_v27 = vpop.f32.mrf.mxu1 }
 0x259   :  { %v364_v28 = vpop.xlane.xlu0 %363 }
 0x25a   :  { %v365_v29 = vsub.f32 %v357_v22, %v364_v28 }
 0x25c   :  { %v366_v30 = vmul.f32 1.442695, %v365_v29 }
 0x25e   :  { %867 = vpow2.f32 %v366_v30 }
 0x26b   :  { %v868_v2 = vpop.eup %867 }
 0x26c   :  { %v368_v31 = vsel %vm361_vm2, %v868_v2, 0.0 }
 0x26d   :  { %369 = vadd.xlane.f32.xlu0 %v368_v31 }
 0x2c0   :  { %v635_v32 = vpop.xlane.xlu1 %634 }
 0x2c1   :  { %v636_v33 = vsub.f32 %v629_v25, %v635_v32 }
 0x2c3   :  { %v637_v34 = vmul.f32 1.442695, %v636_v33 }
 0x2c5   :  { %869 = vpow2.f32 %v637_v34 }
 0x2d2   :  { %v870_v35 = vpop.eup %869 }
 0x2d3   :  { %v639_v36 = vsel %vm361_vm2, %v870_v35, 0.0 }
 0x2d4   :  { %640 = vadd.xlane.f32.xlu0 %v639_v36 }
 0x2f6   :  { %v370_v37 = vpop.xlane.xlu0 %369 }
 0x2f7   :  { %871 = vrcp.f32 %v370_v37 }
 0x304   :  { %v872_v38 = vpop.eup %871 }
 0x305   :  { %v372_v39 = vmul.f32 %v872_v38, %v868_v2 }
 0x307   :  { %373 = vst.msk [vmem:[#allocation2] sm:$0x1] %vm361_vm2, %v372_v39 }
 0x35d   :  { %v641_v40 = vpop.xlane.xlu0 %640 }
 0x35e   :  { %873 = vrcp.f32 %v641_v40 }
 0x36b   :  { %v874_v41 = vpop.eup %873 }
 0x36c   :  { %v643_v42 = vmul.f32 %v874_v41, %v870_v35 }
 0x36e   :  { %644 = vst.msk [vmem:[#allocation2 + $0x1] sm:$0x1] %vm361_vm2, %v643_v42 }
 0x36f   :  { %886 = shalt.err (!%p883_p4)
}
 0x370   :  { %654 = dma.vmem_to_hbm [thread:$0]  %s652_s7, 32, %s1087_s6, [#allocation3]  }
 0x371   :  { %895 = dma.done.wait [#allocation3], 32  }
 0x372   :  { %896 = vsyncadd [#allocation3], 4294967264 }
 0x373   :  { %658 = vsyncpa [#allocation3], 1 }

</bundles_post_ra>
